<compile_context>
chip_gen: v7x
topology: tpu7x:2x2x1
jax: 0.10.0
libtpu: 0.0.40
codegen_flags: <defaults>
</compile_context>

<pallas_src>
import math

import jax
import jax.numpy as jnp
from jax.experimental import pallas as pl
from jax.experimental.pallas import tpu as pltpu


def make_positional_encoding(max_seq_len: int, embed_dim: int,
                             dtype=jnp.float32) -> jnp.ndarray:
    """Sinusoidal PE buffer identical to the PyTorch __init__ (built once; pass
    `dtype` = model dtype so the forward pass never re-casts it)."""
    assert embed_dim % 2 == 0, "embed_dim must be even (same as the PyTorch module)"
    position = jnp.arange(max_seq_len, dtype=jnp.float32)[:, None]            # (L, 1)
    div_term = jnp.exp(
        jnp.arange(0, embed_dim, 2, dtype=jnp.float32) * (-math.log(10000.0) / embed_dim)
    )                                                                          # (E/2,)
    pe = jnp.zeros((max_seq_len, embed_dim), dtype=jnp.float32)
    pe = pe.at[:, 0::2].set(jnp.sin(position * div_term))
    pe = pe.at[:, 1::2].set(jnp.cos(position * div_term))
    return pe.astype(dtype)


def _add_pe_kernel(x_ref, pe_ref, o_ref):
    # x_ref/o_ref: (1, TR, C) block of one batch element; pe_ref: (TR, C) same rows.
    # Dtypes are guaranteed equal by the wrapper -> no hidden per-element cast.
    o_ref[...] = x_ref[...] + pe_ref[...]


def _default_block_bytes() -> int:
    """Per-generation row-tile byte target (HBM-roofline vs per-step overhead)."""
    try:
        kind = jax.devices()[0].device_kind.lower()
    except Exception:
        kind = ""
    if "v7" in kind or "7x" in kind:
        # 3.2 TB/s HBM -> 2 MiB blocks leave ~20% step overhead; 6 MiB blocks
        # (~36 MiB double-buffered footprint) stay well inside 64 MiB per-TC VMEM.
        return 6 * 1024 * 1024
    if "v6" in kind:
        return 4 * 1024 * 1024        # ~86% of roofline, 24 MiB footprint
    return 2 * 1024 * 1024            # v5e / unknown: 2 MiB already amortizes overhead


def _lane_dense_view(s: int, e: int):
    """Per-batch 2D view (R, C) with R*C == S*E and C a multiple of 128 so stores
    are unmasked `vst`. Returns None if no such view exists (route to XLA)."""
    if e % 128 == 0:
        return s, e
    flat = s * e
    if flat % 128 != 0:
        return None
    c = 128
    for cand in (256, 512, 1024):
        if flat % cand == 0:
            c = cand
    return flat // c, c


def positional_encoding_forward(
    x: jnp.ndarray,
    pe: jnp.ndarray,
    *,
    target_block_bytes: int | None = None,
    min_pallas_bytes: int = 4 * 1024 * 1024,   # below this an XLA fused add wins
    min_grid_steps: int = 8,                   # keep both v7x TCs fed with pipelined iters
    force_pallas: bool = False,                # testing hook: bypass size heuristics
) -> jnp.ndarray:
    """x: (B, S, E); pe: (max_seq_len, E). Returns x + pe[:S] broadcast over batch.

    Note: pe should be pre-built in the model dtype (see make_positional_encoding);
    unlike PyTorch's implicit promotion, a mismatched pe is cast down to x.dtype.
    """
    b, s, e = x.shape
    max_len, pe_e = pe.shape
    if s > max_len:
        raise ValueError(f"seq_len {s} exceeds max_seq_len {max_len} of the PE buffer")
    if e != pe_e:
        raise ValueError(f"embed_dim mismatch: x has {e}, pe has {pe_e}")
    if pe.dtype != x.dtype:
        pe = pe.astype(x.dtype)   # one-off; avoid by building pe in the model dtype

    itemsize = jnp.dtype(x.dtype).itemsize
    total_bytes = b * s * e * itemsize

    def xla_path():
        return x + pe[:s, :][None, :, :]

    if not force_pallas and total_bytes < min_pallas_bytes:
        return xla_path()

    view = _lane_dense_view(s, e)
    if view is None:
        return xla_path()          # masked partial stores would be slow; XLA is fine
    r, c = view

    if e % 128 == 0:
        # No reshape and, crucially, NO pe slice copy: pass the full pe buffer and
        # let the BlockSpec index_map read only the first S rows.
        x_view = x
        pe_view = pe
    else:
        x_view = x.reshape(b, r, c)
        pe_view = pe[:s, :].reshape(r, c)   # reshape path: slice is unavoidable here

    if target_block_bytes is None:
        target_block_bytes = _default_block_bytes()

    # Row tile: ~target_block_bytes per block, (8,128)/(16,128)/(32,128)-tiling legal.
    sub_mult = {4: 8, 2: 16, 1: 32}.get(itemsize, 8)
    tr = target_block_bytes // (c * itemsize)
    tr = max(sub_mult, (tr // sub_mult) * sub_mult)
    tr = min(tr, r)

    # Keep enough grid steps so each v7x TensorCore gets several pipelined iterations.
    while tr > sub_mult and pl.cdiv(r, tr) * b < min_grid_steps:
        tr = max(sub_mult, ((tr // 2) // sub_mult) * sub_mult)

    num_t = pl.cdiv(r, tr)
    if not force_pallas and num_t * b < 4:
        return xla_path()          # grid too small to amortize a pallas_call

    # Double-buffered footprint: 2x (x block) + 2x (out block) + 2x (pe block).
    block_bytes = tr * c * itemsize
    footprint = 6 * block_bytes
    vmem_limit = int(min(48 * 1024 * 1024,
                         max(32 * 1024 * 1024, footprint * 1.25)))

    # Grid order (row-tile, batch): pe's block index is constant over the inner
    # batch sweep, so its re-DMA is skipped; both axes "parallel" (megacore).
    out_view = pl.pallas_call(
        _add_pe_kernel,
        out_shape=jax.ShapeDtypeStruct((b, r, c), x.dtype),
        grid_spec=pltpu.PrefetchScalarGridSpec(
            num_scalar_prefetch=0,
            grid=(num_t, b),
            in_specs=[
                pl.BlockSpec((1, tr, c), lambda t, i: (i, t, 0)),   # x
                pl.BlockSpec((tr, c), lambda t, i: (t, 0)),         # pe (batch-invariant)
            ],
            out_specs=pl.BlockSpec((1, tr, c), lambda t, i: (i, t, 0)),
        ),
        input_output_aliases={0: 0},   # output fully replaces x; reuse its buffer
        compiler_params=pltpu.CompilerParams(
            dimension_semantics=("parallel", "parallel"),
            vmem_limit_bytes=vmem_limit,
        ),
    )(x_view, pe_view)

    return out_view.reshape(b, s, e)


if __name__ == "__main__":
    max_seq_len = 512  # constructor arg; default 98280 shrunk for the example

    # Case 1: lane-dense embed dim (E % 128 == 0). Small shapes, so force the
    # Pallas path (with a small block target) to exercise the kernel itself.
    b1, s1, e1 = 2, 256, 128
    pe1 = make_positional_encoding(max_seq_len, e1)
    x1 = jax.random.normal(jax.random.PRNGKey(0), (b1, s1, e1), dtype=jnp.float32)
    out1 = jax.block_until_ready(
        positional_encoding_forward(x1, pe1, force_pallas=True,
                                    target_block_bytes=64 * 1024))
    ref1 = x1 + pe1[:s1, :][None, :, :]
    assert out1.shape == (b1, s1, e1)
    assert jnp.allclose(out1, ref1, atol=1e-6), "case 1 mismatch vs reference"

    # Case 2: small embed dim (E=32) -> kernel uses the lane-dense flattened view.
    b2, s2, e2 = 2, 256, 32
    pe2 = make_positional_encoding(max_seq_len, e2)
    x2 = jax.random.normal(jax.random.PRNGKey(1), (b2, s2, e2), dtype=jnp.float32)
    out2 = jax.block_until_ready(
        positional_encoding_forward(x2, pe2, force_pallas=True,
                                    target_block_bytes=16 * 1024))
    ref2 = x2 + pe2[:s2, :][None, :, :]
    assert jnp.allclose(out2, ref2, atol=1e-6), "case 2 mismatch vs reference"

    # Case 3: tiny input with default heuristics -> fused XLA fast path.
    b3, s3, e3 = 2, 8, 32
    pe3 = make_positional_encoding(max_seq_len, e3)
    x3 = jax.random.normal(jax.random.PRNGKey(2), (b3, s3, e3), dtype=jnp.float32)
    out3 = jax.block_until_ready(positional_encoding_forward(x3, pe3))
    ref3 = x3 + pe3[:s3, :][None, :, :]
    assert jnp.allclose(out3, ref3, atol=1e-6), "case 3 mismatch vs reference"

    print("KERNEL_OK")
</pallas_src>

<mosaic_0001>
module attributes {stable_mosaic.version = 11 : i64} {
  func.func @_add_pe_kernel(%arg0: i32, %arg1: i32, %arg2: memref<1x64x128xf32, #tpu.memory_space<vmem>>, %arg3: memref<64x128xf32, #tpu.memory_space<vmem>>, %arg4: memref<1x64x128xf32, #tpu.memory_space<vmem>>) attributes {dimension_semantics = [#tpu.dimension_semantics<parallel>, #tpu.dimension_semantics<parallel>], iteration_bounds = array<i64: 4, 2>, scalar_prefetch = 0 : i64, scratch_operands = 0 : i64, tpu.core_type = #tpu.core_type<tc>, window_params = [{transform_indices = @transform_0, window_bounds = array<i64: 1, 64, 128>}, {transform_indices = @transform_1, window_bounds = array<i64: 64, 128>}, {transform_indices = @transform_2, window_bounds = array<i64: 1, 64, 128>}]} {
    %c0 = arith.constant 0 : index
    %c0_0 = arith.constant 0 : index
    %c0_1 = arith.constant 0 : index
    %0 = vector.load %arg2[%c0, %c0_0, %c0_1] : memref<1x64x128xf32, #tpu.memory_space<vmem>>, vector<1x64x128xf32>
    %c0_2 = arith.constant 0 : index
    %c0_3 = arith.constant 0 : index
    %1 = vector.load %arg3[%c0_2, %c0_3] : memref<64x128xf32, #tpu.memory_space<vmem>>, vector<64x128xf32>
    %2 = vector.shape_cast %1 : vector<64x128xf32> to vector<1x64x128xf32>
    %3 = arith.addf %0, %2 : vector<1x64x128xf32>
    %c0_4 = arith.constant 0 : index
    %c0_5 = arith.constant 0 : index
    %c0_6 = arith.constant 0 : index
    %4 = vector.load %arg4[%c0_4, %c0_5, %c0_6] : memref<1x64x128xf32, #tpu.memory_space<vmem>>, vector<1x64x128xf32>
    tpu.vector_store %arg4[%c0_4, %c0_5, %c0_6], %3 {strides = array<i32>} : memref<1x64x128xf32, #tpu.memory_space<vmem>>, vector<1x64x128xf32>,
    return
  }
  func.func @transform_0(%arg0: i32, %arg1: i32) -> (i32, i32, i32) {
    %c0_i32 = arith.constant 0 : i32
    %c0_i32_0 = arith.constant 0 : i32
    return %arg1, %arg0, %c0_i32 : i32, i32, i32
  }
  func.func @transform_1(%arg0: i32, %arg1: i32) -> (i32, i32) {
    %c0_i32 = arith.constant 0 : i32
    %c0_i32_0 = arith.constant 0 : i32
    return %arg0, %c0_i32 : i32, i32
  }
  func.func @transform_2(%arg0: i32, %arg1: i32) -> (i32, i32, i32) {
    %c0_i32 = arith.constant 0 : i32
    %c0_i32_0 = arith.constant 0 : i32
    return %arg1, %arg0, %c0_i32 : i32, i32, i32
  }
}

</mosaic_0001>

<bundles_post_ra>
// kernel: tpu_custom_call.1
= control target key start
LH: loop header
LB: loop body
LE: loop exit
PB: predicated region body
PF: predicated region fallthrough
CT: control target
= control target key end

     0   :  { %7 = vsyncpa [#allocation3], 0  ;;  %s838_s0 = inlined_call_operand.hbm [shape: f32[2,256,128], index: 0, kind: input, shape index: {}, may-alias: {0,2}]   ;;  %s839_s1 = inlined_call_operand.vmem [shape: f32[512,128], index: 1, kind: input, shape index: {}]   ;;  %s840_s2 = inlined_call_operand.hbm [shape: f32[2,256,128], index: 2, kind: output, shape index: {}, may-alias: {0,2}]  }
   0x1   :  { %9 = vsyncpa [#allocation3 + $0x1], 0 }
   0x2   :  { %10 = vsyncpa [#allocation4], 0 }
   0x3   :  { %12 = vsyncpa [#allocation4 + $0x1], 0  ;;  %s606_s9 = smov 0   ;;  %s608_s10 = smov 0  }
   0x4   :  { %s610_s11 = smov 0   ;;  %s612_s12 = smov 0  }
   0x5   :  { %s614_s13 = smov 0   ;;  %s616_s14 = smov 0  }
   0x6   :  { %s618_s15 = smov 0   ;;  %s620_s16 = smov 0  }
   0x7 LB: > { %s354_s17 = sadd.s32 4294967295, %s583_s16   ;;  %s355_s18 = sadd.s32 4294967294, %s583_s16   ;;  %s583_s16 = sphi %s620_s16, %s18_s16   ;;  %s579_s15 = sphi %s618_s15, %s855_s15   ;;  %s575_s14 = sphi %s616_s14, %s854_s14   ;;  %s571_s13 = sphi %s614_s13, %s853_s13   ;;  %s567_s12 = sphi %s612_s12, %s852_s12   ;;  %s563_s11 = sphi %s610_s11, %s851_s11   ;;  %s559_s10 = sphi %s608_s10, %s850_s10   ;;  %s555_s9 = sphi %s606_s9, %s849_s9  }
   0x8   : > { %s27_s19 = sadd.s32 1, %s575_s14  ;;  %s30_s20 = sadd.s32 1, %s579_s15 }
   0x9   : > { %p28_p0 = scmp.ge.s32.totalorder %s27_s19, 2  ;;  %s39_s21 = sadd.s32 1, %s563_s11 }
   0xa   : > { %p46_p1 = scmp.ne.s32.totalorder %s563_s11, %s559_s10  ;;  %p47_p2 = scmp.eq.s32.totalorder %s583_s16, 0 }
   0xb   : > { %s857_s19 = smov (%p28_p0, %s27_s19), 0  ;;  %s859_s20 = smov (!%p28_p0, %s30_s20), %s579_s15 }
   0xc   : > { %s34_s22 = ssub.s32 %s575_s14, %s857_s19  ;;  %p659_p3 = por %p47_p2, %p46_p1 }
   0xd   : > { %p32_p4 = scmp.ge.s32.totalorder %s859_s20, 4  ;;  %p52_p5 = scmp.ne.s32.totalorder %s559_s10, %s555_s9 }
   0xe   : > { %p53_p6 = scmp.eq.s32.totalorder %s354_s17, 0  ;;  %p104_p7 = scmp.eq.s32.totalorder %s354_s17, 7 }
   0xf   : > { %s861_s20 = smov (%p32_p4, %s859_s20), 0  ;;  %p110_p10 = scmp.eq.s32.totalorder %s355_s18, 7 }
  0x10   : > { %p667_p8 = por %p53_p6, %p52_p5  ;;  %p671_p9 = por %p104_p7, %p46_p1 }
  0x11   : > { %s35_s26 = ssub.s32 %s579_s15, %s861_s20  ;;  %p677_p12 = por %p110_p10, %p52_p5 }
  0x12   : > { %s844_s25 = scalar_select %p671_p9, 1, 0 }
  0x13   : > { %s36_s27 = sor.u32 %s35_s26, %s34_s22  ;;  %p385_p13 = scmp.lt.s32.totalorder %s583_s16, 8 }
  0x14   : > { %p37_p11 = scmp.eq.s32.totalorder %s36_s27, 0  ;;  %s130_s29 = sand.u32 1, %s563_s11  }
  0x15   : > { %s845_s28 = scalar_select %p677_p12, 1, 0 }
  0x16   : > { %s684_s30 = scalar_select %p37_p11, %s563_s11, %s39_s21  }
  0x17   : > { %s358_s3 = sshll.u32 %s130_s29, 6  ;;  %s359_s4 = sshll.u32 %s579_s15, 3 }
  0x18   : > { %s360_s5 = sshll.u32 %s575_s14, 5  ;;  %s134_s6 = scalar_lea.vmem [#allocation2], %s358_s3 }
  0x19   : > { %s143_s7 = sshll.u32 %s134_s6, 4  ;;  %s140_s8 = sadd.s32 %s360_s5, %s359_s4  ;;  %s688_s7 = int_to_ptr.vmem [resolvable:$true] %s143_s7 }
  0x1a   : > { %s361_s17 = sshll.u32 %s140_s8, 7  ;;  %p692_p0 = pnand %p385_p13, %p659_p3 }
  0x1b   : > { %s699_s21 = scalar_lea.hbm %s838_s0, %s361_s17  ;;  %s701_s27 = scalar_lea.sflag [#allocation3], %s130_s29 }
  0x1c   : > { %s455_s3 = scalar_lea.hbm %s699_s21, 1024  ;;  %p457_p2 = pneg %p692_p0 }
  0x1d   : > { %p456_p1 = scmp.ne.s32.totalorder %s699_s21, %s455_s3  ;;  %s460_s5 = scalar_lea.hbm %s838_s0, 8192 }
  0x1e   : > { %p461_p5 = scmp.lt.u32.totalorder %s699_s21, %s838_s0  ;;  %p462_p6 = scmp.lt.u32.totalorder %s460_s5, %s455_s3 }
  0x1f   : > { %p458_p3 = pnand %p457_p2, %p456_p1  ;;  %p464_p10 = scmp.lt.u32.totalorder %s455_s3, %s699_s21 }
  0x20   : > { %p463_p7 = por %p462_p6, %p461_p5 }
  0x21   : > { %p459_p4 = pneg %p458_p3 }
  0x22   : > { %p465_p11 = por %p464_p10, %p463_p7 }
  0x24   : > { %p466_p13 = pnand %p465_p11, %p459_p4 }
  0x26   : > { %469 = shalt.err (!%p466_p13)
}
  0x27   : > { %s470_s29 = scalar_lea.vmem %s688_s7, 1024  ;;  %s585_s17 = smov [#allocation2]  }
  0x28   : > { %p471_p1 = scmp.ne.s32.totalorder %s688_s7, %s470_s29  ;;  %s475_s22 = sshll.u32 %s585_s17, 4  ;;  %s476_s22 = int_to_ptr.vmem [resolvable:$false] %s475_s22 }
  0x29   : > { %s477_s26 = scalar_lea.vmem %s476_s22, 2048  ;;  %p478_p9 = scmp.lt.s32.totalorder %s688_s7, %s476_s22 }
  0x2a   : > { %p473_p3 = pnand %p471_p1, %p457_p2  ;;  %p479_p5 = scmp.lt.s32.totalorder %s477_s26, %s470_s29 }
  0x2c   : > { %p474_p12 = pneg %p473_p3  ;;  %p480_p6 = por %p479_p5, %p478_p9 }
  0x2e   : > { %p481_p7 = pnand %p480_p6, %p474_p12 }
  0x30   : > { %484 = shalt.err (!%p481_p7)
}
  0x31   : > { %s586_s3 = smov 128   ;;  %s587_s23 = smov 8  }
  0x32   : > { %380 = dma.hbm_to_vmem [thread:$0]  (!%p692_p0), %s699_s21, 1024, %s688_s7, %s701_s27, %s586_s3, %s586_s3, %s587_s23  }
  0x33   : > { %p362_p2 = scmp.ge.s32.totalorder %s583_s16, 1  ;;  %p160_p4 = scmp.lt.s32.totalorder %s583_s16, 9 }
  0x35   : > { %p161_p10 = pnand %p362_p2, %p160_p4 }
  0x36   : > { %s732_s4 = sand.u32 (!%p161_p10), 1, %s559_s10  }
  0x37   : > { %164 = sbr.rel (%p161_p10) target bundleno = 94 (0x5e), region = 28  ;;  %s363_s5 = sshll.u32 (!%p161_p10), %s732_s4, 6 }
  0x38   : > { %s167_s6 = scalar_lea.sflag (!%p161_p10), [#allocation3], %s732_s4  ;;  %s736_s8 = scalar_lea.vmem (!%p161_p10), [#allocation2], %s363_s5 }
  0x3e   : > { %546 = dma.done.wait (%p667_p8), %s167_s6, 1024  }
  0x3f   : > { %548 = vsyncadd (%p667_p8), %s167_s6, 4294966272  ;;  %s365_s7 = sshll.u32 %s571_s13, 3  ;;  %s369_s18 = sshll.u32 %s567_s12, 5  ;;  %v204_v0 = vld [vmem:[%s736_s8] sm:$0xff]  ;;  %v205_v2 = vld [vmem:[%s736_s8 + $0x8] sm:$0xff] }
  0x40   : > { %p198_p9 = scmp.lt.s32.totalorder %s365_s7, 63  ;;  %s749_s24 = sadd.s32 %s369_s18, %s365_s7  ;;  %v206_v5 = vld [vmem:[%s736_s8 + $0x10] sm:$0xff]  ;;  %v207_v9 = vld [vmem:[%s736_s8 + $0x18] sm:$0xff]  ;;  %v208_v11 = vld [vmem:[%s736_s8 + $0x20] sm:$0xff] }
  0x41   : > { %s754_s12 = scalar_lea.vmem [#allocation5], %s363_s5  ;;  %s370_s26 = sshll.u32 %s749_s24, 7  ;;  %v209_v14 = vld [vmem:[%s736_s8 + $0x28] sm:$0xff]  ;;  %v210_v18 = vld [vmem:[%s736_s8 + $0x30] sm:$0xff]  ;;  %v211_v20 = vld [vmem:[%s736_s8 + $0x38] sm:$0xff] }
  0x42   : > { %s199_s21 = scalar_select %p198_p9, %s365_s7, 63 }
  0x43   : > { %s252_s13 = sshll.u32 %s754_s12, 4  ;;  %s778_s5 = scalar_lea.hbm %s840_s2, %s370_s26  ;;  %s768_s13 = int_to_ptr.vmem [resolvable:$true] %s252_s13 }
  0x44   : > { %s366_s27 = sshll.u32 %s199_s21, 3  ;;  %s237_s6 = scalar_lea.sflag [#allocation4], %s732_s4 }
  0x45   : > { %s747_s22 = scalar_lea.vmem %s839_s1, %s366_s27  ;;  %s485_s7 = scalar_lea.vmem %s768_s13, 1024 }
  0x46   : > { %v212_v1 = vld [vmem:[%s747_s22] sm:$0xff]  ;;  %v213_v4 = vld [vmem:[%s747_s22 + $0x8] sm:$0xff]  ;;  %v214_v6 = vld [vmem:[%s747_s22 + $0x10] sm:$0xff]  ;;  %p486_p8 = scmp.ne.s32.totalorder %s768_s13, %s485_s7  ;;  %p847_p12 = scmp.ne.s32.totalorder %s844_s25, 0 }
  0x47   : > { %v220_v3 = vadd.f32 %v212_v1, %v204_v0  ;;  %v221_v7 = vadd.f32 %v213_v4, %v205_v2  ;;  %v222_v8 = vadd.f32 %v214_v6, %v206_v5  ;;  %v215_v10 = vld [vmem:[%s747_s22 + $0x18] sm:$0xff]  ;;  %v216_v13 = vld [vmem:[%s747_s22 + $0x20] sm:$0xff]  ;;  %v217_v15 = vld [vmem:[%s747_s22 + $0x28] sm:$0xff]  ;;  %s588_s8 = smov [#allocation5]  }
  0x48   : > { %v223_v12 = vadd.f32 %v215_v10, %v207_v9  ;;  %v224_v16 = vadd.f32 %v216_v13, %v208_v11  ;;  %v225_v17 = vadd.f32 %v217_v15, %v209_v14  ;;  %v218_v19 = vld [vmem:[%s747_s22 + $0x30] sm:$0xff]  ;;  %v219_v22 = vld [vmem:[%s747_s22 + $0x38] sm:$0xff]  ;;  %p487_p0 = pnand %p486_p8, %p847_p12  ;;  %s489_s18 = sshll.u32 %s588_s8, 4  ;;  %s490_s18 = int_to_ptr.vmem [resolvable:$false] %s489_s18 }
  0x49   : > { %228 = vst [vmem:[%s754_s12] sm:$0xff] %v220_v3  ;;  %229 = vst [vmem:[%s754_s12 + $0x8] sm:$0xff] %v221_v7  ;;  %v226_v21 = vadd.f32 %v218_v19, %v210_v18  ;;  %v227_v23 = vadd.f32 %v219_v22, %v211_v20  ;;  %s491_s21 = scalar_lea.vmem %s490_s18, 2048  ;;  %p492_p13 = scmp.lt.s32.totalorder %s768_s13, %s490_s18 }
  0x4a   : > { %230 = vst [vmem:[%s754_s12 + $0x10] sm:$0xff] %v222_v8  ;;  %231 = vst [vmem:[%s754_s12 + $0x18] sm:$0xff] %v223_v12  ;;  %p488_p11 = pneg %p487_p0  ;;  %p493_p1 = scmp.lt.s32.totalorder %s491_s21, %s485_s7 }
  0x4b   : > { %232 = vst [vmem:[%s754_s12 + $0x20] sm:$0xff] %v224_v16  ;;  %233 = vst [vmem:[%s754_s12 + $0x28] sm:$0xff] %v225_v17 }
  0x4c   : > { %234 = vst [vmem:[%s754_s12 + $0x30] sm:$0xff] %v226_v21  ;;  %235 = vst [vmem:[%s754_s12 + $0x38] sm:$0xff] %v227_v23  ;;  %p494_p3 = por %p493_p1, %p492_p13 }
  0x4e   : > { %p495_p5 = pnand %p494_p3, %p488_p11 }
  0x50   : > { %498 = shalt.err (!%p495_p5)
}
  0x51   : > { %s499_s27 = scalar_lea.hbm %s778_s5, 1024  ;;  %s503_s22 = scalar_lea.hbm %s840_s2, 8192 }
  0x52   : > { %p500_p6 = scmp.ne.s32.totalorder %s778_s5, %s499_s27  ;;  %p504_p4 = scmp.lt.u32.totalorder %s778_s5, %s840_s2 }
  0x53   : > { %p505_p10 = scmp.lt.u32.totalorder %s503_s22, %s499_s27  ;;  %p507_p8 = scmp.lt.u32.totalorder %s499_s27, %s778_s5 }
  0x54   : > { %p501_p7 = pnand %p500_p6, %p847_p12 }
  0x55   : > { %p506_p9 = por %p505_p10, %p504_p4 }
  0x56   : > { %p502_p2 = pneg %p501_p7 }
  0x57   : > { %p508_p0 = por %p507_p8, %p506_p9 }
  0x59   : > { %p509_p11 = pnand %p508_p0, %p502_p2 }
  0x5b   : > { %512 = shalt.err (!%p509_p11)
}
  0x5c   : > { %s589_s26 = smov 128   ;;  %s590_s3 = smov 8  }
  0x5d   : > { %375 = dma.vmem_to_hbm [thread:$0]  (%p847_p12), %s768_s13, 1024, %s778_s5, %s237_s6, %s589_s26, %s589_s26, %s590_s3  }
  0x5e PF: > { %p386_p13 = scmp.ge.s32.totalorder %s583_s16, 2  ;;  %s267_s23 = sand.u32 1, %s555_s9  }
  0x5f   : > { %p848_p1 = scmp.ne.s32.totalorder %s845_s28, 0  ;;  %s268_s7 = scalar_lea.sflag [#allocation4], %s267_s23 }
  0x61   : > { %p382_p3 = pnand %p386_p13, %p848_p1 }
  0x63   : > { %550 = dma.done.wait (!%p382_p3), %s268_s7, 1024  }
  0x64   : > { %552 = vsyncadd (!%p382_p3), %s268_s7, 4294966272  ;;  %s18_s16 = sadd.s32 1, %s583_s16   ;;  %s849_s9 = smov %s559_s10 }
  0x65   : > { %p15_p5 = scmp.ge.s32.totalorder %s18_s16, 10   ;;  %s850_s10 = smov %s563_s11 }
  0x66   : > { %s851_s11 = smov %s684_s30  ;;  %s852_s12 = smov %s575_s14 }
  0x67   : > { %s853_s13 = smov %s579_s15  ;;  %s854_s14 = smov %s857_s19 }
  0x68   : > { %s855_s15 = smov %s861_s20  ;;  %17 = sbr.rel (!%p15_p5) target bundleno = 7 (0x7), region = 76 }
  0x6f   :  { %273 = vsyncpa [#allocation3], 1 }
  0x70   :  { %275 = vsyncpa [#allocation3 + $0x1], 1 }
  0x71   :  { %276 = vsyncpa [#allocation4], 1 }
  0x72   :  { %278 = vsyncpa [#allocation4 + $0x1], 1 }

</bundles_post_ra>
